<compile_context>
chip_gen: v6e
topology: v6e:2x2x1
jax: 0.10.0
libtpu: 0.0.40
codegen_flags: <defaults>
</compile_context>

<pallas_src>
import functools

import jax
import jax.numpy as jnp
from jax.experimental import pallas as pl
from jax.experimental.pallas import tpu as pltpu


def _ffn_kernel(x_ref, w13_ref, w2_ref, o_ref, acc_ref, *, th):
    # grid = (T // tm, hidden // th); axis 1 (hidden chunks) is the reduction axis.
    k = pl.program_id(1)

    @pl.when(k == 0)
    def _():
        acc_ref[...] = jnp.zeros_like(acc_ref)

    x = x_ref[...]                                                     # (tm, dim)   bf16
    # One fused matmul for W1|W3 chunk: (tm, dim) @ (dim, 2*th) -> (tm, 2*th) f32
    h13 = jnp.dot(x, w13_ref[...], preferred_element_type=jnp.float32)
    h1 = h13[:, :th]
    h3 = h13[:, th:]

    # SiLU(h1) * h3 in f32.  sigmoid(h1) = 1 / (1 + exp(-h1)); recip -> EUP slot.
    gate = h1 * pl.reciprocal(1.0 + jnp.exp(-h1), approx=True)
    g = (gate * h3).astype(w2_ref.dtype)                               # (tm, th) bf16

    acc_ref[...] += jnp.dot(g, w2_ref[...],
                            preferred_element_type=jnp.float32)        # (tm, dim) f32

    @pl.when(k == pl.num_programs(1) - 1)
    def _():
        o_ref[...] = acc_ref[...].astype(o_ref.dtype)


def _pick_tile(n, target, align):
    """Largest tile <= target that divides n, stepping by `align`; fall back to n."""
    t = min(target, n)
    while t > align and n % t != 0:
        t -= align
    if t <= 0 or n % t != 0:
        t = n  # full extent is always a legal block
    return t


def feed_forward(x, w1, w3, w2, *, tm=256, th=256,
                 compute_dtype=jnp.bfloat16, vmem_limit_bytes=48 * 1024 * 1024):
    """x: (T, dim); w1, w3: (dim, hidden); w2: (hidden, dim) -> (T, dim).

    Weights are stored transposed vs. PyTorch nn.Linear so the kernel does plain
    row-major matmuls on the MXU.  Matmuls run in `compute_dtype` (bf16 by
    default) with f32 accumulation; output keeps x.dtype.
    """
    T, dim = x.shape
    hidden = w1.shape[1]

    tm = _pick_tile(T, tm, 8)         # sublane-aligned token tile
    th = _pick_tile(hidden, th, 128)  # lane-aligned hidden chunk
    nk = hidden // th

    xc = x.astype(compute_dtype)
    # Interleave W1/W3 per hidden-chunk so each grid step reads one contiguous
    # (dim, 2*th) block: columns [k*2*th : (k+1)*2*th) = [w1 chunk k | w3 chunk k].
    w13 = jnp.concatenate(
        [w1.reshape(dim, nk, th), w3.reshape(dim, nk, th)], axis=2
    ).reshape(dim, 2 * hidden).astype(compute_dtype)
    w2c = w2.astype(compute_dtype)

    grid = (T // tm, nk)
    kernel = functools.partial(_ffn_kernel, th=th)

    return pl.pallas_call(
        kernel,
        out_shape=jax.ShapeDtypeStruct((T, dim), x.dtype),
        grid_spec=pltpu.PrefetchScalarGridSpec(
            num_scalar_prefetch=0,
            grid=grid,
            in_specs=[
                pl.BlockSpec((tm, dim), lambda i, k: (i, 0)),        # x tile
                pl.BlockSpec((dim, 2 * th), lambda i, k: (0, k)),    # fused W1|W3 chunk
                pl.BlockSpec((th, dim), lambda i, k: (k, 0)),        # W2 chunk
            ],
            out_specs=pl.BlockSpec((tm, dim), lambda i, k: (i, 0)),
            scratch_shapes=[pltpu.VMEM((tm, dim), jnp.float32)],
        ),
        compiler_params=pltpu.CompilerParams(
            dimension_semantics=("parallel", "arbitrary"),
            vmem_limit_bytes=vmem_limit_bytes,
        ),
    )(xc, w13, w2c)


if __name__ == "__main__":
    # Small config consistent with the module: dim=128, hidden_dim = 4*dim = 512.
    batch, seq, dim = 2, 8, 128
    hidden = 4 * dim

    key = jax.random.PRNGKey(0)
    kx, k1, k2, k3 = jax.random.split(key, 4)

    x = jax.random.normal(kx, (batch, seq, dim), dtype=jnp.float32)
    # Deterministic "Linear" weights; stored pre-transposed for the kernel.
    w1 = jax.random.normal(k1, (dim, hidden), dtype=jnp.float32) * (dim ** -0.5)
    w3 = jax.random.normal(k3, (dim, hidden), dtype=jnp.float32) * (dim ** -0.5)
    w2 = jax.random.normal(k2, (hidden, dim), dtype=jnp.float32) * (hidden ** -0.5)

    x2d = x.reshape(batch * seq, dim)
    out = feed_forward(x2d, w1, w3, w2).reshape(batch, seq, dim)
    out = jax.block_until_ready(out)

    # Pure-JAX reference with the same bf16 rounding on matmul operands, f32 math.
    xb = x.astype(jnp.bfloat16).astype(jnp.float32)
    w1b = w1.astype(jnp.bfloat16).astype(jnp.float32)
    w3b = w3.astype(jnp.bfloat16).astype(jnp.float32)
    w2b = w2.astype(jnp.bfloat16).astype(jnp.float32)
    g_ref = (jax.nn.silu(jnp.dot(xb, w1b)) * jnp.dot(xb, w3b))
    g_ref = g_ref.astype(jnp.bfloat16).astype(jnp.float32)
    ref = jnp.dot(g_ref, w2b)

    assert jnp.allclose(out, ref, atol=2e-2, rtol=2e-2), "mismatch vs reference"

    print("KERNEL_OK")
</pallas_src>

<mosaic_0001>
module attributes {stable_mosaic.version = 11 : i64} {
  func.func @_ffn_kernel(%arg0: i32, %arg1: i32, %arg2: memref<16x128xbf16, #tpu.memory_space<vmem>>, %arg3: memref<128x512xbf16, #tpu.memory_space<vmem>>, %arg4: memref<256x128xbf16, #tpu.memory_space<vmem>>, %arg5: memref<16x128xf32, #tpu.memory_space<vmem>>, %arg6: memref<16x128xf32, #tpu.memory_space<vmem>>) attributes {dimension_semantics = [#tpu.dimension_semantics<parallel>, #tpu.dimension_semantics<arbitrary>], iteration_bounds = array<i64: 1, 2>, scalar_prefetch = 0 : i64, scratch_operands = 1 : i64, tpu.core_type = #tpu.core_type<tc>, window_params = [{transform_indices = @transform_0, window_bounds = array<i64: 16, 128>}, {transform_indices = @transform_1, window_bounds = array<i64: 128, 512>}, {transform_indices = @transform_2, window_bounds = array<i64: 256, 128>}, {transform_indices = @transform_3, window_bounds = array<i64: 16, 128>}]} {
    %c0_i32 = arith.constant 0 : i32
    %0 = arith.cmpi eq, %arg1, %c0_i32 : i32
    %1 = arith.extui %0 : i1 to i32
    %c0_i32_0 = arith.constant 0 : i32
    %2 = arith.cmpi ne, %1, %c0_i32_0 : i32
    scf.if %2 {
      %cst_14 = arith.constant 0.000000e+00 : f32
      %25 = vector.broadcast %cst_14 : f32 to vector<16x128xf32>
      %c0_15 = arith.constant 0 : index
      %c0_16 = arith.constant 0 : index
      %26 = vector.load %arg6[%c0_15, %c0_16] : memref<16x128xf32, #tpu.memory_space<vmem>>, vector<16x128xf32>
      tpu.vector_store %arg6[%c0_15, %c0_16], %25 {strides = array<i32>} : memref<16x128xf32, #tpu.memory_space<vmem>>, vector<16x128xf32>,
    } else {
    }
    %c0 = arith.constant 0 : index
    %c0_1 = arith.constant 0 : index
    %3 = vector.load %arg2[%c0, %c0_1] : memref<16x128xbf16, #tpu.memory_space<vmem>>, vector<16x128xbf16>
    %c0_2 = arith.constant 0 : index
    %c0_3 = arith.constant 0 : index
    %4 = vector.load %arg3[%c0_2, %c0_3] : memref<128x512xbf16, #tpu.memory_space<vmem>>, vector<128x512xbf16>
    %cst = arith.constant dense<0.000000e+00> : vector<16x512xf32>
    %5 = tpu.matmul %3, %4, %cst {dimension_numbers = #tpu.dot_dimension_numbers<[1], [0], [0], [1], [0, 0, 1, 1], [], []>} : vector<16x128xbf16>, vector<128x512xbf16>, vector<16x512xf32> -> vector<16x512xf32>
    %6 = vector.extract_strided_slice %5 {offsets = [0, 0], sizes = [16, 256], strides = [1, 1]} : vector<16x512xf32> to vector<16x256xf32>
    %7 = vector.extract_strided_slice %5 {offsets = [0, 256], sizes = [16, 256], strides = [1, 1]} : vector<16x512xf32> to vector<16x256xf32>
    %cst_4 = arith.constant 0.000000e+00 : f32
    %8 = vector.broadcast %cst_4 : f32 to vector<16x256xf32>
    %9 = arith.subf %8, %6 : vector<16x256xf32>
    %10 = math.exp %9 : vector<16x256xf32>
    %cst_5 = arith.constant 1.000000e+00 : f32
    %11 = vector.broadcast %cst_5 : f32 to vector<16x256xf32>
    %12 = arith.addf %11, %10 : vector<16x256xf32>
    %13 = tpu.reciprocal %12 {approx = true} : vector<16x256xf32> -> vector<16x256xf32>
    %14 = arith.mulf %6, %13 : vector<16x256xf32>
    %15 = arith.mulf %14, %7 : vector<16x256xf32>
    %16 = arith.truncf %15 : vector<16x256xf32> to vector<16x256xbf16>
    %c0_6 = arith.constant 0 : index
    %c0_7 = arith.constant 0 : index
    %17 = vector.load %arg6[%c0_6, %c0_7] : memref<16x128xf32, #tpu.memory_space<vmem>>, vector<16x128xf32>
    %c0_8 = arith.constant 0 : index
    %c0_9 = arith.constant 0 : index
    %18 = vector.load %arg4[%c0_8, %c0_9] : memref<256x128xbf16, #tpu.memory_space<vmem>>, vector<256x128xbf16>
    %cst_10 = arith.constant dense<0.000000e+00> : vector<16x128xf32>
    %19 = tpu.matmul %16, %18, %cst_10 {dimension_numbers = #tpu.dot_dimension_numbers<[1], [0], [0], [1], [0, 0, 1, 1], [], []>} : vector<16x256xbf16>, vector<256x128xbf16>, vector<16x128xf32> -> vector<16x128xf32>
    %20 = arith.addf %17, %19 : vector<16x128xf32>
    %c0_11 = arith.constant 0 : index
    %c0_12 = arith.constant 0 : index
    %21 = vector.load %arg6[%c0_11, %c0_12] : memref<16x128xf32, #tpu.memory_space<vmem>>, vector<16x128xf32>
    tpu.vector_store %arg6[%c0_11, %c0_12], %20 {strides = array<i32>} : memref<16x128xf32, #tpu.memory_space<vmem>>, vector<16x128xf32>,
    %c1_i32 = arith.constant 1 : i32
    %22 = arith.cmpi eq, %arg1, %c1_i32 : i32
    %23 = arith.extui %22 : i1 to i32
    %c0_i32_13 = arith.constant 0 : i32
    %24 = arith.cmpi ne, %23, %c0_i32_13 : i32
    scf.if %24 {
      %c0_14 = arith.constant 0 : index
      %c0_15 = arith.constant 0 : index
      %25 = vector.load %arg6[%c0_14, %c0_15] : memref<16x128xf32, #tpu.memory_space<vmem>>, vector<16x128xf32>
      %c0_16 = arith.constant 0 : index
      %c0_17 = arith.constant 0 : index
      %26 = vector.load %arg5[%c0_16, %c0_17] : memref<16x128xf32, #tpu.memory_space<vmem>>, vector<16x128xf32>
      tpu.vector_store %arg5[%c0_16, %c0_17], %25 {strides = array<i32>} : memref<16x128xf32, #tpu.memory_space<vmem>>, vector<16x128xf32>,
    } else {
    }
    return
  }
  func.func @transform_0(%arg0: i32, %arg1: i32) -> (i32, i32) {
    %c0_i32 = arith.constant 0 : i32
    %c0_i32_0 = arith.constant 0 : i32
    return %arg0, %c0_i32 : i32, i32
  }
  func.func @transform_1(%arg0: i32, %arg1: i32) -> (i32, i32) {
    %c0_i32 = arith.constant 0 : i32
    %c0_i32_0 = arith.constant 0 : i32
    return %c0_i32, %arg1 : i32, i32
  }
  func.func @transform_2(%arg0: i32, %arg1: i32) -> (i32, i32) {
    %c0_i32 = arith.constant 0 : i32
    %c0_i32_0 = arith.constant 0 : i32
    return %arg1, %c0_i32 : i32, i32
  }
  func.func @transform_3(%arg0: i32, %arg1: i32) -> (i32, i32) {
    %c0_i32 = arith.constant 0 : i32
    %c0_i32_0 = arith.constant 0 : i32
    return %arg0, %c0_i32 : i32, i32
  }
}

</mosaic_0001>

<bundles_post_ra>
// kernel: tpu_custom_call.1
= control target key start
LH: loop header
LB: loop body
LE: loop exit
PB: predicated region body
PF: predicated region fallthrough
CT: control target
= control target key end

     0   :  { %8 = vsyncpa [#allocation4], 0  ;;  %s1546_s0 = inlined_call_operand.hbm [shape: bf16[16,128], index: 0, kind: input, shape index: {}]   ;;  %s1547_s1 = inlined_call_operand.hbm [shape: bf16[128,1024], index: 1, kind: input, shape index: {}]   ;;  %s1548_s2 = inlined_call_operand.hbm [shape: bf16[512,128], index: 2, kind: input, shape index: {}]   ;;  %s1549_s3 = inlined_call_operand.hbm [shape: f32[16,128], index: 3, kind: output, shape index: {}]  }
   0x1   :  { %9 = vsyncpa [#allocation7], 0 }
   0x2   :  { %11 = vsyncpa [#allocation7 + $0x1], 0 }
   0x3   :  { %12 = vsyncpa [#allocation5], 0  ;;  %s1331_s12 = smov 0   ;;  %s1333_s13 = smov 0  }
   0x4   :  { %s1335_s14 = smov 0   ;;  %s1337_s15 = smov 0  }
   0x5   :  { %s1339_s16 = smov 0   ;;  %s1341_s17 = smov 0  }
   0x6 LB: > { %s27_s18 = sadd.s32 1, %s1292_s16  ;;  %s63_s19 = sadd.s32 1, %s1284_s14  ;;  %s1296_s17 = sphi %s1341_s17, %s18_s17   ;;  %s1292_s16 = sphi %s1339_s16, %s1558_s16   ;;  %s1288_s15 = sphi %s1337_s15, %s1557_s15   ;;  %s1284_s14 = sphi %s1335_s14, %s1556_s14   ;;  %s1280_s13 = sphi %s1333_s13, %s1555_s13   ;;  %s1276_s12 = sphi %s1331_s12, %s1554_s12  }
   0x7   : > { %p28_p0 = scmp.ge.s32.totalorder %s27_s18, 2  ;;  %p70_p1 = scmp.ne.s32.totalorder %s1284_s14, %s1280_s13 }
   0x8   : > { %p71_p2 = scmp.eq.s32.totalorder %s1296_s17, 0  ;;  %p988_p4 = scmp.lt.s32.totalorder %s1296_s17, 2 }
   0x9   : > { %s1560_s18 = smov (%p28_p0, %s27_s18), 0  ;;  %s168_s21 = sand.u32 1, %s1296_s17  }
   0xa   : > { %p72_p3 = por %p71_p2, %p70_p1  ;;  %s60_s20 = ssub.s32 %s1292_s16, %s1560_s18 }
   0xb   : > { %p61_p5 = scmp.eq.s32.totalorder %s60_s20, 0  ;;  %s170_s22 = sand.u32 1, %s1284_s14  }
   0xc   : > { %s940_s23 = sshll.u32 %s1292_s16, 8  ;;  %s875_s25 = sshll.u32 %s170_s22, 8 }
   0xd   : > { %s1375_s24 = scalar_select %p61_p5, %s1284_s14, %s63_s19  }
   0xe   : > { %s178_s28 = scalar_lea.hbm %s1547_s1, %s940_s23  ;;  %p1382_p6 = pnand %p988_p4, %p72_p3 }
   0xf   : > { %s172_s30 = scalar_lea.vmem [#allocation6], %s875_s25  ;;  %s1386_s5 = scalar_lea.sflag [#allocation7], %s168_s21 }
  0x10   : > { %s179_s4 = sshll.u32 %s172_s30, 4  ;;  %p1134_p7 = pneg %p1382_p6  ;;  %s180_s4 = int_to_ptr.vmem [resolvable:$true] %s179_s4 }
  0x11   : > { %s1145_s6 = scalar_lea.vmem %s180_s4, 4096  ;;  %s1298_s7 = smov [#allocation6]  }
  0x12   : > { %p1146_p8 = scmp.ne.s32.totalorder %s180_s4, %s1145_s6  ;;  %s1150_s8 = sshll.u32 %s1298_s7, 4  ;;  %s1151_s8 = int_to_ptr.vmem [resolvable:$false] %s1150_s8 }
  0x13   : > { %s1152_s9 = scalar_lea.vmem %s1151_s8, 8192  ;;  %p1153_p11 = scmp.lt.s32.totalorder %s180_s4, %s1151_s8 }
  0x14   : > { %p1148_p9 = pnand %p1146_p8, %p1134_p7  ;;  %p1154_p12 = scmp.lt.s32.totalorder %s1152_s9, %s1145_s6 }
  0x16   : > { %p1149_p10 = pneg %p1148_p9  ;;  %p1155_p13 = por %p1154_p12, %p1153_p11 }
  0x18   : > { %p1156_p0 = pnand %p1155_p13, %p1149_p10 }
  0x1a   : > { %1159 = shalt.err (!%p1156_p0)
}
  0x1b   : > { %s1299_s10 = smov 512   ;;  %s1300_s11 = smov 256  }
  0x1c   : > { %s1301_s19 = smov 16   ;;  %s1397_s20 = sadd.s32 4294967295, %s1296_s17  }
  0x1d   : > { %983 = dma.hbm_to_vmem [thread:$0]  (!%p1382_p6), %s178_s28, 4096, %s180_s4, %s1386_s5, %s1299_s10, %s1300_s11, %s1301_s19  }
  0x1e   : > { %p76_p1 = scmp.ne.s32.totalorder %s1280_s13, %s1276_s12  ;;  %p77_p2 = scmp.eq.s32.totalorder %s1397_s20, 0 }
  0x1f   : > { %p872_p3 = scmp.ge.s32.totalorder %s1296_s17, 1  ;;  %p139_p4 = scmp.lt.s32.totalorder %s1296_s17, 3 }
  0x20   : > { %p1406_p5 = por %p77_p2, %p76_p1  ;;  %s1302_s25 = smov [#allocation3]  }
  0x21   : > { %p1410_p8 = pnand %p872_p3, %p139_p4  ;;  %s154_s26 = sshll.u32 %s1302_s25, 4  ;;  %s155_s26 = int_to_ptr.vmem [resolvable:$true] %s154_s26 }
  0x22   : > { %s878_s12 = sshll.u32 %s170_s22, 7  ;;  %s941_s27 = sshll.u32 %s1292_s16, 11 }
  0x23   : > { %p976_p9 = pneg %p1410_p8  ;;  %s1428_s6 = scalar_lea.hbm %s1548_s2, %s941_s27 }
  0x24   : > { %s193_s7 = scalar_lea.vmem [#allocation8], %s878_s12  ;;  %s1171_s9 = scalar_lea.vmem %s155_s26, 128 }
  0x25   : > { %p1421_p10 = pnand %p976_p9, %p77_p2  ;;  %s200_s8 = sshll.u32 %s193_s7, 4  ;;  %s1430_s8 = int_to_ptr.vmem [resolvable:$true] %s200_s8 }
  0x26   : > { %p1172_p12 = scmp.ne.s32.totalorder %s155_s26, %s1171_s9  ;;  %p1179_p1 = scmp.lt.s32.totalorder %s155_s26, %s155_s26 }
  0x27   : > { %p1162_p11 = pneg %p1421_p10  ;;  %p1180_p3 = scmp.lt.s32.totalorder %s1171_s9, %s1171_s9 }
  0x29   : > { %p1174_p13 = pnand %p1172_p12, %p1162_p11  ;;  %p1181_p4 = por %p1180_p3, %p1179_p1 }
  0x2b   : > { %p1175_p0 = pneg %p1174_p13 }
  0x2d   : > { %p1182_p9 = pnand %p1181_p4, %p1175_p0 }
  0x2f   : > { %1185 = shalt.err (!%p1182_p9)
}
  0x30   : > { %s1303_s22 = smov 64   ;;  %s1304_s10 = smov 4  }
  0x31   : > { %979 = dma.hbm_to_vmem [thread:$0]  (!%p1421_p10), %s1546_s0, 128, %s155_s26, [#allocation4], %s1303_s22, %s1303_s22, %s1304_s10  }
  0x32   : > { %s1199_s25 = scalar_lea.vmem %s1430_s8, 2048  ;;  %s1305_s12 = smov [#allocation8]  }
  0x33   : > { %p1200_p11 = scmp.ne.s32.totalorder %s1430_s8, %s1199_s25  ;;  %s1204_s27 = sshll.u32 %s1305_s12, 4  ;;  %s1205_s27 = int_to_ptr.vmem [resolvable:$false] %s1204_s27 }
  0x34   : > { %s1206_s30 = scalar_lea.vmem %s1205_s27, 4096  ;;  %p1207_p0 = scmp.lt.s32.totalorder %s1430_s8, %s1205_s27 }
  0x35   : > { %p1202_p12 = pnand %p1200_p11, %p1134_p7  ;;  %p1208_p1 = scmp.lt.s32.totalorder %s1206_s30, %s1199_s25 }
  0x37   : > { %p1203_p13 = pneg %p1202_p12  ;;  %p1209_p3 = por %p1208_p1, %p1207_p0 }
  0x39   : > { %p1210_p4 = pnand %p1209_p3, %p1203_p13 }
  0x3b   : > { %1213 = shalt.err (!%p1210_p4)
}
  0x3c   : > { %986 = dma.hbm_to_vmem [thread:$0]  (!%p1382_p6), %s1428_s6, 2048, %s1430_s8, %s1386_s5, %s1303_s22, %s1303_s22, %s1304_s10  }
  0x3d   : > { %212 = sbr.rel (%p1410_p8) target bundleno = 582 (0x246), region = 32 }
  0x42   : > { %1263 = dma.done.wait (%p77_p2), [#allocation4], 128  }
  0x43   : > { %1265 = vsyncadd (%p77_p2), [#allocation4], 4294967168  ;;  %s218_s26 = sand.u32 1, %s1397_s20   ;;  %s220_s28 = sand.u32 1, %s1280_s13  }
  0x44   : > { %s883_s4 = sshll.u32 %s220_s28, 8  ;;  %s219_s29 = scalar_lea.sflag [#allocation7], %s218_s26 }
  0x45   : > { %s1458_s7 = scalar_lea.vmem [#allocation6], %s883_s4 }
  0x46   : > { %1267 = dma.done.wait (%p1406_p5), %s219_s29, 6144  }
  0x47   : > { %1269 = vsyncadd (%p1406_p5), %s219_s29, 4294961152  ;;  %s884_s5 = sshll.u32 %s220_s28, 7  ;;  %p885_p6 = scmp.ne.s32.totalorder %s1288_s15, 0 }
  0x48   : > { %s1464_s23 = scalar_lea.vmem [#allocation8], %s884_s5 }
  0x49   : > { %262 = sbr.rel (%p885_p6) target bundleno = 80 (0x50), region = 48 }
  0x4e   : > { %v1306_v0 = vmov 0.0  }
  0x4f   : > { %263 = vst [vmem:[#allocation2] sm:$0xff] %v1306_v0  ;;  %264 = vst [vmem:[#allocation2 + $0x8] sm:$0xff] %v1306_v0 }
  0x50 PF: > { %v1051_v1 = vld [vmem:[%s1458_s7 + $0xe4] ss:$16 sps:$4 sm:$0xff]   ;;  %v1053_v2 = vld [vmem:[%s1458_s7 + $0xe0] ss:$16 sps:$4 sm:$0xff]   ;;  %v1307_v3 = vmov 0   ;;  %v1078_v29 = vld [vmem:[#allocation3] sm:$0xff]  }
  0x51   : > { %497 = vmatprep.mubr.bf16.mxu0 %v1307_v3  ;;  %540 = vmatprep.mubr.bf16.mxu1 %v1307_v3  ;;  %v1054_v4 = vld [vmem:[%s1458_s7 + $0xc4] ss:$16 sps:$4 sm:$0xff]   ;;  %v1056_v5 = vld [vmem:[%s1458_s7 + $0xc0] ss:$16 sps:$4 sm:$0xff]   ;;  %v1075_v10 = vld [vmem:[%s1458_s7 + $0xec] ss:$16 sps:$4 sm:$0xff]  }
  0x52   : > { %465 = vmatprep.subr.bf16.mxu0 %v1051_v1  ;;  %v1057_v6 = vld [vmem:[%s1458_s7 + $0xa4] ss:$16 sps:$4 sm:$0xff]   ;;  %v1059_v7 = vld [vmem:[%s1458_s7 + $0xa0] ss:$16 sps:$4 sm:$0xff]   ;;  %v1077_v11 = vld [vmem:[%s1458_s7 + $0xe8] ss:$16 sps:$4 sm:$0xff]   ;;  %508 = vmatprep.subr.bf16.mxu1 %v1075_v10 }
  0x53   : > { %466 = vmatpush1.bf16.msra.mxu0 %v1053_v2  ;;  %v1060_v8 = vld [vmem:[%s1458_s7 + $0x84] ss:$16 sps:$4 sm:$0xff]   ;;  %v1062_v9 = vld [vmem:[%s1458_s7 + $0x80] ss:$16 sps:$4 sm:$0xff]   ;;  %v1079_v13 = vld [vmem:[%s1458_s7 + $0xcc] ss:$16 sps:$4 sm:$0xff]   ;;  %509 = vmatpush1.bf16.msra.mxu1 %v1077_v11 }
  0x54   : > { %467 = vmatprep.subr.bf16.mxu0 %v1054_v4  ;;  %v1063_v12 = vld [vmem:[%s1458_s7 + $0x64] ss:$16 sps:$4 sm:$0xff]   ;;  %v1081_v14 = vld [vmem:[%s1458_s7 + $0xc8] ss:$16 sps:$4 sm:$0xff]   ;;  %v1065_v15 = vld [vmem:[%s1458_s7 + $0x60] ss:$16 sps:$4 sm:$0xff]   ;;  %510 = vmatprep.subr.bf16.mxu1 %v1079_v13 }
  0x55   : > { %v1082_v16 = vld [vmem:[%s1458_s7 + $0xac] ss:$16 sps:$4 sm:$0xff]   ;;  %v1066_v17 = vld [vmem:[%s1458_s7 + $0x44] ss:$16 sps:$4 sm:$0xff]   ;;  %v1084_v18 = vld [vmem:[%s1458_s7 + $0xa8] ss:$16 sps:$4 sm:$0xff]  }
  0x56   : > { %v1068_v19 = vld [vmem:[%s1458_s7 + $0x40] ss:$16 sps:$4 sm:$0xff]   ;;  %v1085_v20 = vld [vmem:[%s1458_s7 + $0x8c] ss:$16 sps:$4 sm:$0xff]   ;;  %v1069_v21 = vld [vmem:[%s1458_s7 + $0x24] ss:$16 sps:$4 sm:$0xff]  }
  0x57   : > { %468 = vmatpush1.bf16.msra.mxu0 %v1056_v5  ;;  %511 = vmatpush1.bf16.msra.mxu1 %v1081_v14  ;;  %v1071_v22 = vld [vmem:[%s1458_s7 + $0x20] ss:$16 sps:$4 sm:$0xff]   ;;  %v1087_v23 = vld [vmem:[%s1458_s7 + $0x88] ss:$16 sps:$4 sm:$0xff]   ;;  %v1072_v24 = vld [vmem:[%s1458_s7 + $0x4] ss:$16 sps:$4 sm:$0xff]  }
  0x58   : > { %469 = vmatprep.subr.bf16.mxu0 %v1057_v6  ;;  %512 = vmatprep.subr.bf16.mxu1 %v1082_v16  ;;  %v1088_v25 = vld [vmem:[%s1458_s7 + $0x6c] ss:$16 sps:$4 sm:$0xff]   ;;  %v1090_v26 = vld [vmem:[%s1458_s7 + $0x68] ss:$16 sps:$4 sm:$0xff]   ;;  %v1074_v27 = vld [vmem:[%s1458_s7] ss:$16 sps:$4 sm:$0xff]  }
  0x59   : > { %v1091_v28 = vld [vmem:[%s1458_s7 + $0x4c] ss:$16 sps:$4 sm:$0xff]   ;;  %v1093_v30 = vld [vmem:[%s1458_s7 + $0x48] ss:$16 sps:$4 sm:$0xff]   ;;  %v1102_v37 = vld [vmem:[%s1464_s23 + $0x70] sm:$0xff]   ;;  %p935_p7 = scmp.ne.s32.totalorder %s1288_s15, 1 }
  0x5a   : > { %v1094_v31 = vld [vmem:[%s1458_s7 + $0x2c] ss:$16 sps:$4 sm:$0xff]   ;;  %v1096_v32 = vld [vmem:[%s1458_s7 + $0x28] ss:$16 sps:$4 sm:$0xff]   ;;  %v1103_v38 = vld [vmem:[%s1464_s23 + $0x30] sm:$0xff]  }
  0x5b   : > { %470 = vmatpush1.bf16.msra.mxu0 %v1059_v7  ;;  %513 = vmatpush1.bf16.msra.mxu1 %v1084_v18  ;;  %v1097_v33 = vld [vmem:[%s1458_s7 + $0xc] ss:$16 sps:$4 sm:$0xff]   ;;  %v1099_v34 = vld [vmem:[%s1458_s7 + $0x8] ss:$16 sps:$4 sm:$0xff]   ;;  %v1106_v41 = vld [vmem:[%s1464_s23 + $0x60] sm:$0xff]  }
  0x5c   : > { %471 = vmatprep.subr.bf16.mxu0 %v1060_v8  ;;  %514 = vmatprep.subr.bf16.mxu1 %v1085_v20  ;;  %v1100_v35 = vld [vmem:[%s1464_s23 + $0x78] sm:$0xff]   ;;  %v1104_v39 = vld [vmem:[%s1464_s23 + $0x68] sm:$0xff]   ;;  %v1107_v42 = vld [vmem:[%s1464_s23 + $0x20] sm:$0xff]  }
  0x5d   : > { %v1101_v36 = vld [vmem:[%s1464_s23 + $0x38] sm:$0xff]   ;;  %v1105_v40 = vld [vmem:[%s1464_s23 + $0x28] sm:$0xff]   ;;  %v1110_v45 = vld [vmem:[%s1464_s23 + $0x50] sm:$0xff]  }
  0x5e   : > { %v1108_v43 = vld [vmem:[%s1464_s23 + $0x58] sm:$0xff]   ;;  %v1111_v46 = vld [vmem:[%s1464_s23 + $0x10] sm:$0xff]   ;;  %v1112_v47 = vld [vmem:[%s1464_s23 + $0x48] sm:$0xff]  }
  0x5f   : > { %472 = vmatpush1.bf16.msra.mxu0 %v1062_v9  ;;  %515 = vmatpush1.bf16.msra.mxu1 %v1087_v23  ;;  %v1109_v44 = vld [vmem:[%s1464_s23 + $0x18] sm:$0xff]   ;;  %v1113_v48 = vld [vmem:[%s1464_s23 + $0x8] sm:$0xff]   ;;  %v1114_v49 = vld [vmem:[%s1464_s23 + $0x40] sm:$0xff]  }
  0x60   : > { %473 = vmatprep.subr.bf16.mxu0 %v1063_v12  ;;  %516 = vmatprep.subr.bf16.mxu1 %v1088_v25  ;;  %v1115_v50 = vld [vmem:[%s1464_s23] sm:$0xff]  }
  0x63   : > { %474 = vmatpush1.bf16.msra.mxu0 %v1065_v15  ;;  %517 = vmatpush1.bf16.msra.mxu1 %v1090_v26  ;;  %v581_v26 = vld [vmem:[#allocation2] sm:$0xff] }
  0x64   : > { %475 = vmatprep.subr.bf16.mxu0 %v1066_v17  ;;  %518 = vmatprep.subr.bf16.mxu1 %v1091_v28 }
  0x67   : > { %476 = vmatpush1.bf16.msra.mxu0 %v1068_v19  ;;  %519 = vmatpush1.bf16.msra.mxu1 %v1093_v30 }
  0x68   : > { %477 = vmatprep.subr.bf16.mxu0 %v1069_v21  ;;  %520 = vmatprep.subr.bf16.mxu1 %v1094_v31  ;;  %v582_v31 = vld [vmem:[#allocation2 + $0x8] sm:$0xff] }
  0x6b   : > { %478 = vmatpush1.bf16.msra.mxu0 %v1071_v22  ;;  %521 = vmatpush1.bf16.msra.mxu1 %v1096_v32 }
  0x6c   : > { %479 = vmatprep.subr.bf16.mxu0 %v1072_v24  ;;  %522 = vmatprep.subr.bf16.mxu1 %v1097_v33 }
  0x6f   : > { %480 = vmatpush1.bf16.msra.mxu0 %v1074_v27  ;;  %523 = vmatpush1.bf16.msra.mxu1 %v1099_v34 }
  0x70   : > { %942 = vmatprep.subr.bf16.mxu0 %v1100_v35 }
  0x72   : > { %498 = vmatmul.mubr.bf16.vlgmr.msra.gmra.mxu0 %v1078_v29  ;;  %541 = vmatmul.mubr.bf16.vlgmr.msra.gmra.mxu1 %v1078_v29 }
  0x73   : > { %943 = vmatpush3.bf16.msra.mxu0 %v1101_v36 }
  0x74   : > { %944 = vmatprep.subr.bf16.mxu0 %v1102_v37 }
  0x77   : > { %945 = vmatpush3.bf16.msra.mxu0 %v1103_v38 }
  0x78   : > { %946 = vmatprep.subr.bf16.mxu0 %v1104_v39 }
  0x7b   : > { %947 = vmatpush3.bf16.msra.mxu0 %v1105_v40 }
  0x7c   : > { %948 = vmatprep.subr.bf16.mxu0 %v1106_v41 }
  0x7f   : > { %949 = vmatpush3.bf16.msra.mxu0 %v1107_v42 }
  0x80   : > { %950 = vmatprep.subr.bf16.mxu0 %v1108_v43 }
  0x83   : > { %951 = vmatpush3.bf16.msra.mxu0 %v1109_v44 }
  0x84   : > { %952 = vmatprep.subr.bf16.mxu0 %v1110_v45 }
  0x87   : > { %953 = vmatpush3.bf16.msra.mxu0 %v1111_v46 }
  0x88   : > { %954 = vmatprep.subr.bf16.mxu0 %v1112_v47 }
  0x8b   : > { %955 = vmatpush3.bf16.msra.mxu0 %v1113_v48 }
  0x8c   : > { %956 = vmatprep.subr.bf16.mxu0 %v1114_v49 }
  0x8f   : > { %957 = vmatpush3.bf16.msra.mxu0 %v1115_v50 }
 0x132   : > { %v499_v51 = vpop.f32.mrf.mxu0  ;;  %v542_v7 = vpop.f32.mrf.mxu1 }
 0x133   : > { %v551_v52 = vsub.f32 0.0, %v499_v51 }
 0x134   : > { %v501_v53 = vpop.f32.mrf.mxu0  ;;  %v544_v8 = vpop.f32.mrf.mxu1 }
 0x135   : > { %v555_v54 = vmul.f32 1.442695, %v551_v52  ;;  %v552_v55 = vsub.f32 0.0, %v501_v53 }
 0x136   : > { %v503_v56 = vpop.f32.mrf.mxu0  ;;  %v546_v12 = vpop.f32.mrf.mxu1 }
 0x137   : > { %1116 = vpow2.f32 %v555_v54  ;;  %v557_v57 = vmul.f32 1.442695, %v552_v55  ;;  %v553_v58 = vsub.f32 0.0, %v503_v56 }
 0x138   : > { %v505_v59 = vpop.f32.mrf.mxu0  ;;  %v548_v19 = vpop.f32.mrf.mxu1 }
 0x139   : > { %1118 = vpow2.f32 %v557_v57  ;;  %v559_v60 = vmul.f32 1.442695, %v553_v58  ;;  %v554_v61 = vsub.f32 0.0, %v505_v59 }
 0x13b   : > { %1120 = vpow2.f32 %v559_v60  ;;  %v561_v62 = vmul.f32 1.442695, %v554_v61 }
 0x13d   : > { %1122 = vpow2.f32 %v561_v62 }
 0x144   : > { %v1117_v63 = vpop.eup %1116 }
 0x145   : > { %v563_v1 = vadd.f32 1.0, %v1117_v63 }
 0x146   : > { %v1119_v0 = vpop.eup %1118 }
 0x147   : > { %v564_v2 = vadd.f32 1.0, %v1119_v0 }
 0x148   : > { %v1121_v3 = vpop.eup %1120 }
 0x149   : > { %1124 = vrcp.f32 %v564_v2  ;;  %v565_v4 = vadd.f32 1.0, %v1121_v3 }
 0x14a   : > { %v1123_v5 = vpop.eup %1122  ;;  %1126 = vrcp.f32 %v563_v1 }
 0x14b   : > { %1128 = vrcp.f32 %v565_v4  ;;  %v566_v6 = vadd.f32 1.0, %v1123_v5 }
 0x14d   : > { %1130 = vrcp.f32 %v566_v6 }
 0x156   : > { %v1125_v9 = vpop.eup %1124 }
 0x157   : > { %v1127_v10 = vpop.eup %1126  ;;  %v572_v13 = vmul.f32 %v1125_v9, %v501_v53 }
 0x158   : > { %v1129_v11 = vpop.eup %1128  ;;  %v571_v16 = vmul.f32 %v1127_v10, %v499_v51 }
 0x159   : > { %v573_v14 = vmul.f32 %v1129_v11, %v503_v56  ;;  %v576_v20 = vmul.f32 %v572_v13, %v544_v8 }
 0x15a   : > { %v1131_v15 = vpop.eup %1130  ;;  %v575_v22 = vmul.f32 %v571_v16, %v542_v7 }
 0x15b   : > { %v574_v17 = vmul.f32 %v1131_v15, %v505_v59  ;;  %v577_v18 = vmul.f32 %v573_v14, %v546_v12 }
 0x15d   : > { %v578_v21 = vmul.f32 %v574_v17, %v548_v19  ;;  %v579_v24 = vpack.c.bf16 %v577_v18, %v575_v22 }
 0x15f   : > { %v580_v23 = vpack.c.bf16 %v578_v21, %v576_v20 }
 0x161   : > { %743 = vmatprep.mubr.bf16.mxu0 %v580_v23 }
 0x162   : > { %744 = vmatmul.mubr.bf16.vlgmr.msra.gmra.mxu0 %v579_v24 }
 0x222   : > { %v958_v25 = vpop.f32.mrf.mxu0 }
 0x224   : > { %v959_v27 = vpop.f32.mrf.mxu0 }
 0x225   : > { %v960_v28 = vadd.f32 %v959_v27, %v958_v25 }
 0x226   : > { %v961_v29 = vpop.f32.mrf.mxu0 }
 0x227   : > { %v752_v30 = vadd.f32 %v960_v28, %v581_v26 }
 0x228   : > { %v962_v32 = vpop.f32.mrf.mxu0 }
 0x229   : > { %754 = vst [vmem:[#allocation2] sm:$0xff] %v752_v30  ;;  %v963_v33 = vadd.f32 %v962_v32, %v961_v29  ;;  %759 = sbr.rel (%p935_p7) target bundleno = 566 (0x236), region = 52 }
 0x22b   : > { %v753_v34 = vadd.f32 %v963_v33, %v582_v31 }
 0x22d   : > { %755 = vst [vmem:[#allocation2 + $0x8] sm:$0xff] %v753_v34 }
 0x230   : > { %v760_v35 = vld [vmem:[#allocation2] sm:$0xff] }
 0x231   : > { %762 = vst [vmem:[#allocation9] sm:$0xff] %v760_v35 }
 0x234   : > { %v761_v36 = vld [vmem:[#allocation2 + $0x8] sm:$0xff] }
 0x235   : > { %763 = vst [vmem:[#allocation9 + $0x8] sm:$0xff] %v761_v36 }
 0x236 PF: > { %p990_p2 = scmp.eq.s32.totalorder %s1397_s20, 1  ;;  %s1308_s21 = smov [#allocation9]  }
 0x237   : > { %s773_s6 = sshll.u32 %s1308_s21, 4  ;;  %s774_s6 = int_to_ptr.vmem [resolvable:$true] %s773_s6 }
 0x238   : > { %s1214_s8 = scalar_lea.vmem %s774_s6, 256  ;;  %p1221_p9 = scmp.lt.s32.totalorder %s774_s6, %s774_s6 }
 0x239   : > { %p1215_p5 = scmp.ne.s32.totalorder %s774_s6, %s1214_s8  ;;  %p1222_p11 = scmp.lt.s32.totalorder %s1214_s8, %s1214_s8 }
 0x23b   : > { %p1216_p8 = pnand %p1215_p5, %p990_p2  ;;  %p1223_p12 = por %p1222_p11, %p1221_p9 }
 0x23d   : > { %p1217_p10 = pneg %p1216_p8 }
 0x23f   : > { %p1224_p13 = pnand %p1223_p12, %p1217_p10 }
 0x241   : > { %1227 = shalt.err (!%p1224_p13)
}
 0x242   : > { %s1309_s15 = smov 128   ;;  %s1310_s9 = smov 8  }
 0x243   : > { %973 = dma.vmem_to_hbm [thread:$0]  (%p990_p2), %s774_s6, 256, %s1549_s3, [#allocation5], %s1309_s15, %s1309_s15, %s1310_s9  }
 0x244   : > { %1271 = dma.done.wait (%p990_p2), [#allocation5], 256  }
 0x245   : > { %1273 = vsyncadd (%p990_p2), [#allocation5], 4294967040 }
 0x246 PF: > { %s18_s17 = sadd.s32 1, %s1296_s17   ;;  %s1554_s12 = smov %s1280_s13 }
 0x247   : > { %p15_p0 = scmp.ge.s32.totalorder %s18_s17, 4   ;;  %s1555_s13 = smov %s1284_s14 }
 0x248   : > { %s1556_s14 = smov %s1375_s24  ;;  %s1557_s15 = smov %s1292_s16 }
 0x249   : > { %s1558_s16 = smov %s1560_s18  ;;  %17 = sbr.rel (!%p15_p0) target bundleno = 6 (0x6), region = 95 }
 0x24e   :  { %789 = vsyncpa [#allocation4], 1 }
 0x24f   :  { %791 = vsyncpa [#allocation4 + $0x1], 1 }
 0x250   :  { %792 = vsyncpa [#allocation7], 1 }
 0x251   :  { %794 = vsyncpa [#allocation7 + $0x1], 1 }
 0x252   :  { %795 = vsyncpa [#allocation5], 1 }
 0x253   :  { %797 = vsyncpa [#allocation5 + $0x1], 1 }

</bundles_post_ra>
